<compile_context>
chip_gen: v7x
topology: tpu7x:2x2x1
jax: 0.10.0
libtpu: 0.0.40
codegen_flags: <defaults>
</compile_context>

<pallas_src>
import jax
import jax.numpy as jnp
from jax.experimental import pallas as pl
from jax.experimental.pallas import tpu as pltpu

IN_FEATURES = 28 * 28   # 784
OUT_FEATURES = 10
TAU = 2.0
V_THRESHOLD = 1.0
# decay_input=True, v0=v_reset=0  =>  v = y / tau ; spike = (v >= v_th)
#                                 <=> spike = (y >= tau * v_th)
FIRE_THRESHOLD = TAU * V_THRESHOLD   # 2.0

_ROW_TILE = 2048   # f32 batch tile: 2048*784*4 B = 6.4 MB per buffer
_SUBLANE = 8       # f32 sublane pack (satisfies the (8,128) block rule)
_SMALL_B = 256     # below this, a single exact-size tile is fine


def _round_up(n, m):
    return (n + m - 1) // m * m


def snn_kernel(x_ref, w_ref, o_ref):
    # x_ref: (TB, 784) f32   w_ref: (784, 10) f32 (VMEM-resident, constant map)
    # o_ref: (TB, 10) f32 spikes
    y = jnp.dot(x_ref[...], w_ref[...], preferred_element_type=jnp.float32)
    # LIF charge folded into a constant threshold (single timestep, hard reset
    # only mutates internal state, never the returned spikes).
    o_ref[...] = (y >= FIRE_THRESHOLD).astype(jnp.float32)


def prepare_weight(weight):
    """PyTorch Linear weight (10, 784) -> (784, 10) f32. Hoisted: do once."""
    return jnp.transpose(weight).astype(jnp.float32)


def simple_snn_forward(x_nchw, w_t):
    """x_nchw: (B, 1, 28, 28) float; w_t: (784, 10) f32 (pre-transposed)."""
    b = x_nchw.shape[0]
    # nn.Flatten on NCHW == contiguous row-major reshape (no data movement).
    x_flat = x_nchw.reshape(b, IN_FEATURES).astype(jnp.float32)   # (B, 784)

    if b <= _SMALL_B:
        # One exact tile: block_shape == full array dims, so no sublane
        # padding is required and no output slice is needed.
        tb = b
    else:
        # Keep >= 2 tiles (v7x has 2 TensorCores sharding the parallel axis),
        # capped at _ROW_TILE for large B. tb is a multiple of 8 so the ragged
        # last block (if any) is legal and masked by Pallas.
        tb = min(_ROW_TILE, _round_up(pl.cdiv(b, 2), _SUBLANE))
    grid = (pl.cdiv(b, tb),)

    cost = pl.CostEstimate(
        flops=2 * b * IN_FEATURES * OUT_FEATURES,
        bytes_accessed=(b * IN_FEATURES * 4
                        + IN_FEATURES * OUT_FEATURES * 4
                        + b * OUT_FEATURES * 4),
        transcendentals=0,
    )

    return pl.pallas_call(
        snn_kernel,
        out_shape=jax.ShapeDtypeStruct((b, OUT_FEATURES), jnp.float32),
        grid_spec=pltpu.PrefetchScalarGridSpec(
            num_scalar_prefetch=0,
            grid=grid,
            in_specs=[
                # batch tile marches along the grid (ragged tail masked)
                pl.BlockSpec((tb, IN_FEATURES), lambda i: (i, 0)),
                # constant index_map: weight stays VMEM-resident, no re-DMA
                pl.BlockSpec((IN_FEATURES, OUT_FEATURES), lambda i: (0, 0)),
            ],
            out_specs=pl.BlockSpec((tb, OUT_FEATURES), lambda i: (i, 0)),
        ),
        compiler_params=pltpu.CompilerParams(
            dimension_semantics=("parallel",),
            vmem_limit_bytes=32 * 1024 * 1024,
        ),
        cost_estimate=cost,
    )(x_flat, w_t)


if __name__ == "__main__":
    key = jax.random.PRNGKey(0)
    k_x, k_w = jax.random.split(key)

    # Deterministic synthetic Linear(784, 10, bias=False) weight,
    # kaiming-uniform-like bound 1/sqrt(fan_in).
    bound = 1.0 / (IN_FEATURES ** 0.5)
    weight = jax.random.uniform(
        k_w, (OUT_FEATURES, IN_FEATURES), jnp.float32, -bound, bound)
    w_t = prepare_weight(weight)          # transpose done once (hoisted)

    # MNIST-like NCHW batch.
    x = jax.random.normal(k_x, (2, 1, 28, 28), jnp.float32)

    fwd = jax.jit(simple_snn_forward)
    spikes = fwd(x, w_t)
    jax.block_until_ready(spikes)

    # Sanity: binary spikes of shape (B, 10) matching the f32 reference.
    assert spikes.shape == (2, OUT_FEATURES)
    assert bool(jnp.all((spikes == 0.0) | (spikes == 1.0)))
    ref = (x.reshape(2, -1) @ w_t >= FIRE_THRESHOLD).astype(jnp.float32)
    assert bool(jnp.all(spikes == ref))

    # TODO(synk): surrogate.ATan() only affects the backward pass (gradient
    # surrogate); the forward heaviside is implemented exactly above.
    print("KERNEL_OK")
</pallas_src>

<mosaic_0001>
module attributes {stable_mosaic.version = 11 : i64} {
  func.func @snn_kernel(%arg0: i32, %arg1: memref<2x784xf32, #tpu.memory_space<vmem>>, %arg2: memref<784x10xf32, #tpu.memory_space<vmem>>, %arg3: memref<2x10xf32, #tpu.memory_space<vmem>>) attributes {dimension_semantics = [#tpu.dimension_semantics<parallel>], iteration_bounds = array<i64: 1>, scalar_prefetch = 0 : i64, scratch_operands = 0 : i64, tpu.core_type = #tpu.core_type<tc>, window_params = [{transform_indices = @transform_0, window_bounds = array<i64: 2, 784>}, {pipeline_mode = #tpu.pipeline_mode<synchronous>, transform_indices = @transform_1, window_bounds = array<i64: 784, 10>}, {transform_indices = @transform_2, window_bounds = array<i64: 2, 10>}]} {
    %c0 = arith.constant 0 : index
    %c0_0 = arith.constant 0 : index
    %0 = vector.load %arg1[%c0, %c0_0] : memref<2x784xf32, #tpu.memory_space<vmem>>, vector<2x784xf32>
    %c0_1 = arith.constant 0 : index
    %c0_2 = arith.constant 0 : index
    %1 = vector.load %arg2[%c0_1, %c0_2] : memref<784x10xf32, #tpu.memory_space<vmem>>, vector<784x10xf32>
    %cst = arith.constant dense<0.000000e+00> : vector<2x10xf32>
    %2 = tpu.matmul %0, %1, %cst {dimension_numbers = #tpu.dot_dimension_numbers<[1], [0], [0], [1], [0, 0, 1, 1], [], []>} : vector<2x784xf32>, vector<784x10xf32>, vector<2x10xf32> -> vector<2x10xf32>
    %cst_3 = arith.constant 2.000000e+00 : f32
    %3 = vector.broadcast %cst_3 : f32 to vector<2x10xf32>
    %4 = arith.cmpf oge, %2, %3 : vector<2x10xf32>
    %5 = arith.extui %4 : vector<2x10xi1> to vector<2x10xi32>
    %6 = arith.sitofp %5 : vector<2x10xi32> to vector<2x10xf32>
    %c0_4 = arith.constant 0 : index
    %c0_5 = arith.constant 0 : index
    %7 = vector.load %arg3[%c0_4, %c0_5] : memref<2x10xf32, #tpu.memory_space<vmem>>, vector<2x10xf32>
    tpu.vector_store %arg3[%c0_4, %c0_5], %6 {strides = array<i32>} : memref<2x10xf32, #tpu.memory_space<vmem>>, vector<2x10xf32>,
    return
  }
  func.func @transform_0(%arg0: i32) -> (i32, i32) {
    %c0_i32 = arith.constant 0 : i32
    %c0_i32_0 = arith.constant 0 : i32
    return %arg0, %c0_i32 : i32, i32
  }
  func.func @transform_1(%arg0: i32) -> (i32, i32) {
    %c0_i32 = arith.constant 0 : i32
    %c0_i32_0 = arith.constant 0 : i32
    %c0_i32_1 = arith.constant 0 : i32
    return %c0_i32, %c0_i32_0 : i32, i32
  }
  func.func @transform_2(%arg0: i32) -> (i32, i32) {
    %c0_i32 = arith.constant 0 : i32
    %c0_i32_0 = arith.constant 0 : i32
    return %arg0, %c0_i32 : i32, i32
  }
}

</mosaic_0001>

<bundles_post_ra>
// kernel: simple_snn_forward.1
= control target key start
LH: loop header
LB: loop body
LE: loop exit
PB: predicated region body
PF: predicated region fallthrough
CT: control target
= control target key end

     0   :  { %v702_v47 = vmov 1983009808   ;;  %v118_v49 = vlaneseq  ;;  %s1047_s0 = inlined_call_operand.vmem [shape: f32[2,784], index: 0, kind: input, shape index: {}]   ;;  %s1048_s1 = inlined_call_operand.vmem [shape: f32[784,10], index: 1, kind: input, shape index: {}]   ;;  %s1049_s2 = inlined_call_operand.hbm [shape: f32[2,10], index: 2, kind: output, shape index: {}]  }
   0x1   :  { %v30_v0 = vld [vmem:[%s1048_s1 + $0x80] sm:$0xff]  ;;  %v31_v1 = vld [vmem:[%s1048_s1 + $0x88] sm:$0xff]  ;;  %v32_v11 = vld [vmem:[%s1048_s1 + $0x90] sm:$0xff]  ;;  %v116_v48 = vunpack.c.l.s4 %v702_v47 }
   0x2   :  { %v62_v2 = vld [vmem:[%s1048_s1 + $0x180] sm:$0xff]  ;;  %v572_v3 = vpack.c.bf16 %v31_v1, %v30_v0  ;;  %v63_v4 = vld [vmem:[%s1048_s1 + $0x188] sm:$0xff]  ;;  %v33_v13 = vld [vmem:[%s1048_s1 + $0x98] sm:$0xff]  ;;  %v119_v0 = vshrl.u32 %v118_v49, 7 }
   0x3   :  { %v14_v5 = vld [vmem:[%s1048_s1] sm:$0xff]  ;;  %v15_v6 = vld [vmem:[%s1048_s1 + $0x8] sm:$0xff]  ;;  %v604_v7 = vpack.c.bf16 %v63_v4, %v62_v2  ;;  %v64_v14 = vld [vmem:[%s1048_s1 + $0x190] sm:$0xff]  ;;  %v576_v16 = vpack.c.bf16 %v33_v13, %v32_v11  ;;  %v117_v63 = vunpack.c.0.s8 %v116_v48 }
   0x4   :  { %v574_v8 = vpack.c.bf16 %v15_v6, %v14_v5  ;;  %v46_v9 = vld [vmem:[%s1048_s1 + $0x100] sm:$0xff]  ;;  %v47_v10 = vld [vmem:[%s1048_s1 + $0x108] sm:$0xff]  ;;  %573 = vmatprep.subr.bf16.mxu0 %v572_v3  ;;  %v65_v15 = vld [vmem:[%s1048_s1 + $0x198] sm:$0xff] }
   0x5   :  { %v606_v12 = vpack.c.bf16 %v47_v10, %v46_v9  ;;  %605 = vmatprep.subr.bf16.mxu1 %v604_v7  ;;  %v608_v17 = vpack.c.bf16 %v65_v15, %v64_v14  ;;  %v16_v18 = vld [vmem:[%s1048_s1 + $0x10] sm:$0xff]  ;;  %v17_v19 = vld [vmem:[%s1048_s1 + $0x18] sm:$0xff]  ;;  %v34_v23 = vld [vmem:[%s1048_s1 + $0xa0] sm:$0xff]  ;;  %v872_v13 = vsub.s32 %v117_v63, %v119_v0 }
   0x6   :  { %575 = vmatpush3.bf16.msra.mxu0 %v574_v8  ;;  %v48_v20 = vld [vmem:[%s1048_s1 + $0x110] sm:$0xff]  ;;  %v578_v21 = vpack.c.bf16 %v17_v19, %v16_v18  ;;  %v49_v22 = vld [vmem:[%s1048_s1 + $0x118] sm:$0xff]  ;;  %v35_v24 = vld [vmem:[%s1048_s1 + $0xa8] sm:$0xff] }
   0x7   :  { %607 = vmatpush3.bf16.msra.mxu1 %v606_v12  ;;  %577 = vmatprep.subr.bf16.mxu0 %v576_v16  ;;  %v610_v25 = vpack.c.bf16 %v49_v22, %v48_v20  ;;  %v580_v26 = vpack.c.bf16 %v35_v24, %v34_v23  ;;  %v66_v27 = vld [vmem:[%s1048_s1 + $0x1a0] sm:$0xff]  ;;  %v67_v28 = vld [vmem:[%s1048_s1 + $0x1a8] sm:$0xff]  ;;  %v36_v35 = vld [vmem:[%s1048_s1 + $0xb0] sm:$0xff] }
   0x8   :  { %609 = vmatprep.subr.bf16.mxu1 %v608_v17  ;;  %v18_v29 = vld [vmem:[%s1048_s1 + $0x20] sm:$0xff]  ;;  %v612_v30 = vpack.c.bf16 %v67_v28, %v66_v27  ;;  %v19_v31 = vld [vmem:[%s1048_s1 + $0x28] sm:$0xff]  ;;  %v37_v36 = vld [vmem:[%s1048_s1 + $0xb8] sm:$0xff] }
   0x9   :  { %v50_v32 = vld [vmem:[%s1048_s1 + $0x120] sm:$0xff]  ;;  %v51_v33 = vld [vmem:[%s1048_s1 + $0x128] sm:$0xff]  ;;  %v582_v34 = vpack.c.bf16 %v19_v31, %v18_v29  ;;  %v68_v37 = vld [vmem:[%s1048_s1 + $0x1b0] sm:$0xff]  ;;  %v584_v39 = vpack.c.bf16 %v37_v36, %v36_v35 }
   0xa   :  { %579 = vmatpush3.bf16.msra.mxu0 %v578_v21  ;;  %v614_v38 = vpack.c.bf16 %v51_v33, %v50_v32  ;;  %v69_v40 = vld [vmem:[%s1048_s1 + $0x1b8] sm:$0xff]  ;;  %v20_v41 = vld [vmem:[%s1048_s1 + $0x30] sm:$0xff]  ;;  %v38_v46 = vld [vmem:[%s1048_s1 + $0xc0] sm:$0xff] }
   0xb   :  { %611 = vmatpush3.bf16.msra.mxu1 %v610_v25  ;;  %581 = vmatprep.subr.bf16.mxu0 %v580_v26  ;;  %v21_v42 = vld [vmem:[%s1048_s1 + $0x38] sm:$0xff]  ;;  %v616_v43 = vpack.c.bf16 %v69_v40, %v68_v37  ;;  %v52_v44 = vld [vmem:[%s1048_s1 + $0x130] sm:$0xff]  ;;  %v39_v50 = vld [vmem:[%s1048_s1 + $0xc8] sm:$0xff] }
   0xc   :  { %613 = vmatprep.subr.bf16.mxu1 %v612_v30  ;;  %v53_v45 = vld [vmem:[%s1048_s1 + $0x138] sm:$0xff]  ;;  %v70_v51 = vld [vmem:[%s1048_s1 + $0x1c0] sm:$0xff]  ;;  %v71_v52 = vld [vmem:[%s1048_s1 + $0x1c8] sm:$0xff]  ;;  %v586_v53 = vpack.c.bf16 %v21_v42, %v20_v41  ;;  %v588_v55 = vpack.c.bf16 %v39_v50, %v38_v46 }
   0xd   :  { %v618_v54 = vpack.c.bf16 %v53_v45, %v52_v44  ;;  %v22_v56 = vld [vmem:[%s1048_s1 + $0x40] sm:$0xff]  ;;  %v23_v57 = vld [vmem:[%s1048_s1 + $0x48] sm:$0xff]  ;;  %v620_v59 = vpack.c.bf16 %v71_v52, %v70_v51  ;;  %v40_v61 = vld [vmem:[%s1048_s1 + $0xd0] sm:$0xff] }
   0xe   :  { %583 = vmatpush3.bf16.msra.mxu0 %v582_v34  ;;  %v54_v58 = vld [vmem:[%s1048_s1 + $0x140] sm:$0xff]  ;;  %v55_v60 = vld [vmem:[%s1048_s1 + $0x148] sm:$0xff]  ;;  %v41_v62 = vld [vmem:[%s1048_s1 + $0xd8] sm:$0xff]  ;;  %v590_v3 = vpack.c.bf16 %v23_v57, %v22_v56 }
   0xf   :  { %615 = vmatpush3.bf16.msra.mxu1 %v614_v38  ;;  %585 = vmatprep.subr.bf16.mxu0 %v584_v39  ;;  %v72_v1 = vld [vmem:[%s1048_s1 + $0x1d0] sm:$0xff]  ;;  %v73_v2 = vld [vmem:[%s1048_s1 + $0x1d8] sm:$0xff]  ;;  %v622_v4 = vpack.c.bf16 %v55_v60, %v54_v58  ;;  %v592_v5 = vpack.c.bf16 %v41_v62, %v40_v61  ;;  %v42_v11 = vld [vmem:[%s1048_s1 + $0xe0] sm:$0xff] }
  0x10   :  { %617 = vmatprep.subr.bf16.mxu1 %v616_v43  ;;  %v24_v6 = vld [vmem:[%s1048_s1 + $0x50] sm:$0xff]  ;;  %v25_v7 = vld [vmem:[%s1048_s1 + $0x58] sm:$0xff]  ;;  %v624_v9 = vpack.c.bf16 %v73_v2, %v72_v1  ;;  %v43_v12 = vld [vmem:[%s1048_s1 + $0xe8] sm:$0xff] }
  0x11   :  { %v56_v8 = vld [vmem:[%s1048_s1 + $0x150] sm:$0xff]  ;;  %v57_v10 = vld [vmem:[%s1048_s1 + $0x158] sm:$0xff]  ;;  %v74_v14 = vld [vmem:[%s1048_s1 + $0x1e0] sm:$0xff]  ;;  %v594_v16 = vpack.c.bf16 %v25_v7, %v24_v6  ;;  %v596_v19 = vpack.c.bf16 %v43_v12, %v42_v11 }
  0x12   :  { %587 = vmatpush3.bf16.msra.mxu0 %v586_v53  ;;  %v75_v15 = vld [vmem:[%s1048_s1 + $0x1e8] sm:$0xff]  ;;  %v26_v17 = vld [vmem:[%s1048_s1 + $0x60] sm:$0xff]  ;;  %v626_v18 = vpack.c.bf16 %v57_v10, %v56_v8  ;;  %v44_v25 = vld [vmem:[%s1048_s1 + $0xf0] sm:$0xff] }
  0x13   :  { %619 = vmatpush3.bf16.msra.mxu1 %v618_v54  ;;  %589 = vmatprep.subr.bf16.mxu0 %v588_v55  ;;  %v27_v20 = vld [vmem:[%s1048_s1 + $0x68] sm:$0xff]  ;;  %v58_v21 = vld [vmem:[%s1048_s1 + $0x160] sm:$0xff]  ;;  %v628_v23 = vpack.c.bf16 %v75_v15, %v74_v14  ;;  %v45_v26 = vld [vmem:[%s1048_s1 + $0xf8] sm:$0xff] }
  0x14   :  { %621 = vmatprep.subr.bf16.mxu1 %v620_v59  ;;  %v12_v22 = vld [vmem:[%s1047_s0] sm:$0xff]  ;;  %v59_v24 = vld [vmem:[%s1048_s1 + $0x168] sm:$0xff]  ;;  %v76_v29 = vld [vmem:[%s1048_s1 + $0x1f0] sm:$0xff]  ;;  %v598_v31 = vpack.c.bf16 %v27_v20, %v26_v17  ;;  %v600_v35 = vpack.c.bf16 %v45_v26, %v44_v25 }
  0x15   :  { %v121_v27 = vrot.slane %v12_v22, %v872_v13  ;;  %v114_v28 = vcombine.high %v12_v22, %v12_v22  ;;  %v77_v30 = vld [vmem:[%s1048_s1 + $0x1f8] sm:$0xff]  ;;  %v630_v34 = vpack.c.bf16 %v59_v24, %v58_v21  ;;  %v28_v36 = vld [vmem:[%s1048_s1 + $0x70] sm:$0xff]  ;;  %v94_v42 = vld [vmem:[%s1048_s1 + $0x280] sm:$0xff] }
  0x16   :  { %591 = vmatpush3.bf16.msra.mxu0 %v590_v3  ;;  %v29_v37 = vld [vmem:[%s1048_s1 + $0x78] sm:$0xff]  ;;  %v60_v38 = vld [vmem:[%s1048_s1 + $0x170] sm:$0xff]  ;;  %v632_v39 = vpack.c.bf16 %v77_v30, %v76_v29  ;;  %v95_v43 = vld [vmem:[%s1048_s1 + $0x288] sm:$0xff] }
  0x17   :  { %623 = vmatpush3.bf16.msra.mxu1 %v622_v4  ;;  %593 = vmatprep.subr.bf16.mxu0 %v592_v5  ;;  %v129_v32 = vcombine.high %v121_v27, %v121_v27  ;;  %v128_v33 = vrot.slane %v114_v28, %v872_v13  ;;  %v61_v40 = vld [vmem:[%s1048_s1 + $0x178] sm:$0xff]  ;;  %v602_v44 = vpack.c.bf16 %v29_v37, %v28_v36  ;;  %v78_v47 = vld [vmem:[%s1048_s1 + $0x200] sm:$0xff]  ;;  %v79_v48 = vld [vmem:[%s1048_s1 + $0x208] sm:$0xff] }
  0x18   :  { %625 = vmatprep.subr.bf16.mxu1 %v624_v9  ;;  %v634_v45 = vpack.c.bf16 %v61_v40, %v60_v38  ;;  %v636_v46 = vpack.c.bf16 %v95_v43, %v94_v42  ;;  %v96_v49 = vld [vmem:[%s1048_s1 + $0x290] sm:$0xff]  ;;  %v97_v50 = vld [vmem:[%s1048_s1 + $0x298] sm:$0xff]  ;;  %v638_v51 = vpack.c.bf16 %v79_v48, %v78_v47  ;;  %v13_v53 = vld [vmem:[%s1047_s0 + $0x8] sm:$0x3f] }
  0x19   :  { %220 = vmatprep.mubr.f32.mxu0 %v129_v32  ;;  %v130_v41 = vcombine.high %v128_v33, %v128_v33  ;;  %v80_v52 = vld [vmem:[%s1048_s1 + $0x210] sm:$0xff]  ;;  %v110_v54 = vld [vmem:[%s1048_s1 + $0x300] sm:$0xff]  ;;  %v640_v55 = vpack.c.bf16 %v97_v50, %v96_v49  ;;  %v81_v56 = vld [vmem:[%s1048_s1 + $0x218] sm:$0xff]  ;;  %v131_v57 = vcombine.high %v13_v53, %v13_v53  ;;  %v952_v58 = vrot.slane %v13_v53, %v872_v13 }
  0x1a   :  { %595 = vmatpush3.bf16.msra.mxu0 %v594_v16  ;;  %v111_v59 = vld [vmem:[%s1048_s1 + $0x308] sm:$0xff] }
  0x1b   :  { %627 = vmatpush3.bf16.msra.mxu1 %v626_v18  ;;  %597 = vmatprep.subr.bf16.mxu0 %v596_v19 }
  0x1c   :  { %629 = vmatprep.subr.bf16.mxu1 %v628_v23  ;;  %290 = vmatprep.mubr.f32.mxu1 %v130_v41 }
  0x1e   :  { %599 = vmatpush3.bf16.msra.mxu0 %v598_v31 }
  0x1f   :  { %631 = vmatpush3.bf16.msra.mxu1 %v630_v34  ;;  %601 = vmatprep.subr.bf16.mxu0 %v600_v35 }
  0x20   :  { %633 = vmatprep.subr.bf16.mxu1 %v632_v39 }
  0x22   :  { %603 = vmatpush3.bf16.msra.mxu0 %v602_v44 }
  0x23   :  { %635 = vmatpush3.bf16.msra.mxu1 %v634_v45  ;;  %637 = vmatprep.subr.bf16.mxu0 %v636_v46 }
  0x24   :  { %7 = vsyncpa [#allocation3], 0  ;;  %v98_v60 = vld [vmem:[%s1048_s1 + $0x2a0] sm:$0xff]  ;;  %v99_v61 = vld [vmem:[%s1048_s1 + $0x2a8] sm:$0xff]  ;;  %v703_v62 = vmov 0.0|0.0   ;;  %v669_v63 = vpack.c.bf16 %v111_v59, %v110_v54  ;;  %v146_v0 = vcombine.high %v952_v58, %v952_v58  ;;  %v642_v1 = vpack.c.bf16 %v81_v56, %v80_v52 }
  0x25   :  { %668 = vmatprep.subr.bf16.mxu1 %v703_v62  ;;  %221 = vmatmul.mubr.f32.vlgmr.msra.gmra.mrb[0].mxu0 %v121_v27  ;;  %v644_v2 = vpack.c.bf16 %v99_v61, %v98_v60  ;;  %v82_v3 = vld [vmem:[%s1048_s1 + $0x220] sm:$0xff]  ;;  %v83_v4 = vld [vmem:[%s1048_s1 + $0x228] sm:$0xff]  ;;  %v145_v5 = vrot.slane %v131_v57, %v872_v13  ;;  %v100_v6 = vld [vmem:[%s1048_s1 + $0x2b0] sm:$0xff]  ;;  %vm704_vm0 = vmmov 0   ;;  %v705_v8 = vmov 0.0  }
  0x26   :  { %291 = vmatmul.mubr.f32.vlgmr.msra.gmra.mrb[0].mxu1 %v128_v33  ;;  %639 = vmatpush3.bf16.msra.mxu0 %v638_v51  ;;  %v101_v7 = vld [vmem:[%s1048_s1 + $0x2b8] sm:$0xff]  ;;  %vm153_vm1 = vcmask 130048   ;;  %v646_v9 = vpack.c.bf16 %v83_v4, %v82_v3  ;;  %v84_v11 = vld [vmem:[%s1048_s1 + $0x230] sm:$0xff]  ;;  %v102_v13 = vld [vmem:[%s1048_s1 + $0x2c0] sm:$0xff]  ;;  %vm439_vm2 = vcmask 74752  }
  0x27   :  { %641 = vmatprep.subr.bf16.mxu0 %v640_v55  ;;  %360 = vmatprep.mubr.f32.mxu0 %v146_v0  ;;  %v648_v10 = vpack.c.bf16 %v101_v7, %v100_v6  ;;  %v85_v12 = vld [vmem:[%s1048_s1 + $0x238] sm:$0xff]  ;;  %v103_v14 = vld [vmem:[%s1048_s1 + $0x2c8] sm:$0xff]  ;;  %v86_v17 = vld [vmem:[%s1048_s1 + $0x240] sm:$0xff] }
  0x28   :  { %670 = vmatpush3.bf16.msra.mxu1 %v669_v63  ;;  %569 = vmatprep.mubr.msk.f32.mxu1 %vm704_vm0, %v705_v8  ;;  %v650_v15 = vpack.c.bf16 %v85_v12, %v84_v11  ;;  %v652_v16 = vpack.c.bf16 %v103_v14, %v102_v13  ;;  %v87_v18 = vld [vmem:[%s1048_s1 + $0x248] sm:$0xff]  ;;  %v104_v19 = vld [vmem:[%s1048_s1 + $0x2d0] sm:$0xff]  ;;  %v105_v20 = vld [vmem:[%s1048_s1 + $0x2d8] sm:$0xff] }
  0x29   :  { %v654_v21 = vpack.c.bf16 %v87_v18, %v86_v17  ;;  %v656_v22 = vpack.c.bf16 %v105_v20, %v104_v19  ;;  %v88_v23 = vld [vmem:[%s1048_s1 + $0x250] sm:$0xff]  ;;  %v89_v24 = vld [vmem:[%s1048_s1 + $0x258] sm:$0xff]  ;;  %v106_v25 = vld [vmem:[%s1048_s1 + $0x2e0] sm:$0xff] }
  0x2a   :  { %643 = vmatpush3.bf16.msra.mxu0 %v642_v1  ;;  %v107_v26 = vld [vmem:[%s1048_s1 + $0x2e8] sm:$0xff]  ;;  %v658_v27 = vpack.c.bf16 %v89_v24, %v88_v23  ;;  %v90_v29 = vld [vmem:[%s1048_s1 + $0x260] sm:$0xff]  ;;  %v108_v31 = vld [vmem:[%s1048_s1 + $0x2f0] sm:$0xff] }
  0x2b   :  { %645 = vmatprep.subr.bf16.mxu0 %v644_v2  ;;  %570 = vmatmul.mubr.msk.f32.vlgmr.msra.gmra.mrb[2].mxu1 %vm153_vm1, %v145_v5  ;;  %v660_v28 = vpack.c.bf16 %v107_v26, %v106_v25  ;;  %v91_v30 = vld [vmem:[%s1048_s1 + $0x268] sm:$0xff]  ;;  %v109_v32 = vld [vmem:[%s1048_s1 + $0x2f8] sm:$0xff]  ;;  %v92_v35 = vld [vmem:[%s1048_s1 + $0x270] sm:$0xff] }
  0x2c   :  { %v662_v33 = vpack.c.bf16 %v91_v30, %v90_v29  ;;  %v664_v34 = vpack.c.bf16 %v109_v32, %v108_v31  ;;  %v93_v36 = vld [vmem:[%s1048_s1 + $0x278] sm:$0xff]  ;;  %s706_s1 = smov [#allocation2]  }
  0x2d   :  { %v666_v37 = vpack.c.bf16 %v93_v36, %v92_v35  ;;  %s447_s11 = sshll.u32 %s706_s1, 4  ;;  %s448_s11 = int_to_ptr.vmem [resolvable:$true] %s447_s11 }
  0x2e   :  { %647 = vmatpush3.bf16.msra.mxu0 %v646_v9  ;;  %s678_s12 = scalar_lea.vmem %s448_s11, 32  ;;  %p683_p1 = scmp.lt.s32.totalorder %s448_s11, %s448_s11 }
  0x2f   :  { %649 = vmatprep.subr.bf16.mxu0 %v648_v10  ;;  %p679_p0 = scmp.ne.s32.totalorder %s448_s11, %s678_s12  ;;  %p684_p2 = scmp.lt.s32.totalorder %s678_s12, %s678_s12 }
  0x31   :  { %p685_p3 = por %p684_p2, %p683_p1 }
  0x32   :  { %651 = vmatpush3.bf16.msra.mxu0 %v650_v15 }
  0x33   :  { %653 = vmatprep.subr.bf16.mxu0 %v652_v16  ;;  %p686_p4 = pnand %p685_p3, %p679_p0 }
  0x36   :  { %655 = vmatpush3.bf16.msra.mxu0 %v654_v21 }
  0x37   :  { %657 = vmatprep.subr.bf16.mxu0 %v656_v22 }
  0x3a   :  { %659 = vmatpush3.bf16.msra.mxu0 %v658_v27 }
  0x3b   :  { %661 = vmatprep.subr.bf16.mxu0 %v660_v28 }
  0x3e   :  { %663 = vmatpush3.bf16.msra.mxu0 %v662_v33 }
  0x3f   :  { %665 = vmatprep.subr.bf16.mxu0 %v664_v34 }
  0x42   :  { %667 = vmatpush3.bf16.msra.mxu0 %v666_v37 }
  0x45   :  { %361 = vmatmul.mubr.f32.vlgmr.msra.gmra.mrb[2].mxu0 %v952_v58 }
  0xf8   :  { %v489_v38 = vpop.f32.mrb[0].mxu0 }
  0xf9   :  { %v524_v39 = vpop.f32.mrb[0].mxu1  ;;  %v490_v40 = vpop.f32.mrb[1].mxu0 }
  0xfa   :  { %v491_v41 = vadd.f32 %v490_v40, %v489_v38  ;;  %v525_v42 = vpop.f32.mrb[1].mxu1 }
  0xfb   :  { %v526_v43 = vadd.f32 %v525_v42, %v524_v39 }
  0xfd   :  { %v293_v44 = vadd.f32 %v526_v43, %v491_v41 }
  0xfe   :  { %v432_v45 = vpop.f32.mrb[2].mxu1 }
  0xff   :  { %v571_v46 = vpop.f32.mrb[3].mxu1 }
 0x118   :  { %v559_v47 = vpop.f32.mrb[2].mxu0 }
 0x119   :  { %v560_v48 = vpop.f32.mrb[3].mxu0 }
 0x11a   :  { %v561_v49 = vadd.f32 %v560_v48, %v559_v47 }
 0x11c   :  { %v363_v50 = vadd.f32 %v561_v49, %v293_v44 }
 0x11e   :  { %v433_v51 = vadd.f32 %v432_v45, %v363_v50 }
 0x120   :  { %vm436_vm3 = vcmp.ge.f32.partialorder %v433_v51, 2.0 }
 0x121   :  { %v456_v52 = vsel %vm436_vm3, 1.0, %v705_v8 }
 0x122   :  { %440 = vst.msk [vmem:[#allocation2] sm:$0x3] %vm439_vm2, %v456_v52 }
 0x123   :  { %689 = shalt.err (!%p686_p4)
}
 0x124   :  { %s690_s15 = scalar_lea.hbm %s1049_s2, 32 }
 0x125   :  { %p691_p5 = scmp.ne.s32.totalorder %s1049_s2, %s690_s15  ;;  %p694_p6 = scmp.lt.u32.totalorder %s690_s15, %s1049_s2 }
 0x127   :  { %p696_p7 = pnand %p694_p6, %p691_p5 }
 0x129   :  { %699 = shalt.err (!%p696_p7)
}
 0x12a   :  { %450 = dma.vmem_to_hbm [thread:$0]  %s448_s11, 32, %s1049_s2, [#allocation3]  }
 0x12b   :  { %700 = dma.done.wait [#allocation3], 32  }
 0x12c   :  { %701 = vsyncadd [#allocation3], 4294967264 }
 0x12d   :  { %454 = vsyncpa [#allocation3], 1 }

</bundles_post_ra>
